<compile_context>
chip_gen: v5e
topology: v5e:2x2
jax: 0.10.0
libtpu: 0.0.40
codegen_flags: <defaults>
</compile_context>

<pallas_src>
import math
import jax
import jax.numpy as jnp
from jax.experimental import pallas as pl
from jax.experimental.pallas import tpu as pltpu

# Small shapes consistent with the module.
BATCH = 2
IN_CH1 = 4          # in_channel1 (channels of x)
IN_CH2 = 8          # in_channel2 (channels of up)
INTER_CH = 16       # inter_channel
DEPTH, HEIGHT, WIDTH = 8, 8, 8
EPS = 1e-5          # InstanceNorm3d default eps


def _kernel(x_ref, u_ref, wx_ref, wg_ref, wpsi_ref, ww_ref,
            b1_ref, bpsi_ref, bw_ref, out_ref):
    # Per grid step (one batch element): x_ref [C1, N], u_ref [C2, N];
    # weights / biases are tiny full-array blocks resident across the grid.
    x = x_ref[...]                                                   # [C1, N]
    u = u_ref[...]                                                   # [C2, N]

    # Fused W_x / W_g 1x1x1 conv + summed bias: two small MXU dots.
    s = (jnp.dot(wx_ref[...], x, preferred_element_type=jnp.float32)
         + jnp.dot(wg_ref[...], u, preferred_element_type=jnp.float32)
         + b1_ref[...])                                              # [CI, N]
    r = jnp.maximum(s, 0.0)                                          # ReLU (VPU)

    # psi: 1x1x1 conv to one channel + sigmoid -> spatial gate [1, N].
    logit = (jnp.dot(wpsi_ref[...], r, preferred_element_type=jnp.float32)
             + bpsi_ref[...])
    attn = jax.nn.sigmoid(logit)                                     # EUP

    # Final 1x1x1 conv on the gated input.
    y = (jnp.dot(ww_ref[...], x * attn, preferred_element_type=jnp.float32)
         + bw_ref[...])                                              # [C1, N]

    # InstanceNorm3d (affine=False): single-pass mean/var per channel over N.
    n = y.shape[-1]
    inv_n = 1.0 / n
    sy = jnp.sum(y, axis=-1, keepdims=True)
    syy = jnp.sum(y * y, axis=-1, keepdims=True)
    mu = sy * inv_n
    var = jnp.maximum(syy * inv_n - mu * mu, 0.0)
    out_ref[...] = ((y - mu) * jax.lax.rsqrt(var + EPS)).astype(out_ref.dtype)


def spatial_attention_3d(x, up, params):
    """x: [B, C1, D, H, W], up: [B, C2, D, H, W]  ->  [B, C1, D, H, W]."""
    wx, bx, wg, bg, wpsi, bpsi, ww, bw = params
    B, C1, D, H, W = x.shape
    C2 = up.shape[1]
    N = D * H * W

    # Reshape only (no data movement): channels stay on sublanes, spatial on lanes.
    x3 = x.reshape(B, C1, N)
    u3 = up.reshape(B, C2, N)
    b1 = (bx + bg)[:, None]          # [CI, 1]  fused bias of W_x + W_g
    bpsi2 = bpsi[:, None]            # [1, 1]
    bw2 = bw[:, None]                # [C1, 1]

    def batch_spec(c):
        # Leading batch dim squeezed out of the kernel ref.
        return pl.BlockSpec((None, c, N), lambda b: (b, 0, 0))

    def full_spec(arr):
        nd = arr.ndim
        return pl.BlockSpec(arr.shape, lambda b, _nd=nd: (0,) * _nd)

    out3 = pl.pallas_call(
        _kernel,
        out_shape=jax.ShapeDtypeStruct((B, C1, N), jnp.float32),
        grid=(B,),
        in_specs=[batch_spec(C1), batch_spec(C2),
                  full_spec(wx), full_spec(wg), full_spec(wpsi), full_spec(ww),
                  full_spec(b1), full_spec(bpsi2), full_spec(bw2)],
        out_specs=pl.BlockSpec((None, C1, N), lambda b: (b, 0, 0)),
        compiler_params=pltpu.CompilerParams(
            dimension_semantics=("parallel",)),
    )(x3, u3, wx, wg, wpsi, ww, b1, bpsi2, bw2)

    return out3.reshape(B, C1, D, H, W)


def reference(x, up, params):
    """Pure-JAX reference mirroring the PyTorch forward (eval mode)."""
    wx, bx, wg, bg, wpsi, bpsi, ww, bw = params

    def conv1x1(t, w, b):            # 1x1x1 Conv3d == per-voxel channel matmul
        return jnp.einsum('oc,bcdhw->bodhw', w, t) + b[None, :, None, None, None]

    x_inter = conv1x1(x, wx, bx)
    g = conv1x1(up, wg, bg)
    attn = jax.nn.sigmoid(conv1x1(jax.nn.relu(x_inter + g), wpsi, bpsi))
    y = conv1x1(x * attn, ww, bw)
    # InstanceNorm3d(affine=False, track_running_stats=False): per (b, c) over spatial.
    mu = y.mean(axis=(2, 3, 4), keepdims=True)
    var = ((y - mu) ** 2).mean(axis=(2, 3, 4), keepdims=True)
    return (y - mu) / jnp.sqrt(var + EPS)


def init_params(key):
    """Conv3d-style uniform init (k=1 -> fan_in = in_channels); weights stored [out, in]."""
    ks = jax.random.split(key, 8)

    def conv_w(k, cout, cin):
        bound = 1.0 / math.sqrt(cin)
        return jax.random.uniform(k, (cout, cin), jnp.float32, -bound, bound)

    def conv_b(k, cout, cin):
        bound = 1.0 / math.sqrt(cin)
        return jax.random.uniform(k, (cout,), jnp.float32, -bound, bound)

    wx = conv_w(ks[0], INTER_CH, IN_CH1)
    bx = conv_b(ks[1], INTER_CH, IN_CH1)
    wg = conv_w(ks[2], INTER_CH, IN_CH2)
    bg = conv_b(ks[3], INTER_CH, IN_CH2)
    wpsi = conv_w(ks[4], 1, INTER_CH)
    bpsi = conv_b(ks[5], 1, INTER_CH)
    ww = conv_w(ks[6], IN_CH1, IN_CH1)
    bw = conv_b(ks[7], IN_CH1, IN_CH1)
    # Note: the module builds nn.InstanceNorm3d(inter_channel) but applies it to an
    # in_channel1-channel tensor; with affine=False it has no parameters, so the
    # normalization is channel-count agnostic and needs no weights here.
    return (wx, bx, wg, bg, wpsi, bpsi, ww, bw)


if __name__ == "__main__":
    root = jax.random.PRNGKey(0)
    kx, ku, kp = jax.random.split(root, 3)

    x = jax.random.normal(kx, (BATCH, IN_CH1, DEPTH, HEIGHT, WIDTH), jnp.float32)
    up = jax.random.normal(ku, (BATCH, IN_CH2, DEPTH, HEIGHT, WIDTH), jnp.float32)
    params = init_params(kp)

    out = spatial_attention_3d(x, up, params)
    out = jax.block_until_ready(out)

    ref = reference(x, up, params)
    assert out.shape == (BATCH, IN_CH1, DEPTH, HEIGHT, WIDTH)
    assert jnp.allclose(out, ref, atol=1e-4, rtol=1e-4), "mismatch vs JAX reference"

    print("KERNEL_OK")
</pallas_src>

<mosaic_0001>
module attributes {stable_mosaic.version = 11 : i64} {
  func.func @_kernel(%arg0: i32, %arg1: memref<1x4x512xf32, #tpu.memory_space<vmem>>, %arg2: memref<1x8x512xf32, #tpu.memory_space<vmem>>, %arg3: memref<16x4xf32, #tpu.memory_space<vmem>>, %arg4: memref<16x8xf32, #tpu.memory_space<vmem>>, %arg5: memref<1x16xf32, #tpu.memory_space<vmem>>, %arg6: memref<4x4xf32, #tpu.memory_space<vmem>>, %arg7: memref<16x1xf32, #tpu.memory_space<vmem>>, %arg8: memref<1x1xf32, #tpu.memory_space<vmem>>, %arg9: memref<4x1xf32, #tpu.memory_space<vmem>>, %arg10: memref<1x4x512xf32, #tpu.memory_space<vmem>>) attributes {dimension_semantics = [#tpu.dimension_semantics<parallel>], iteration_bounds = array<i64: 2>, scalar_prefetch = 0 : i64, scratch_operands = 0 : i64, tpu.core_type = #tpu.core_type<tc>, window_params = [{transform_indices = @transform_0, window_bounds = array<i64: 1, 4, 512>}, {transform_indices = @transform_1, window_bounds = array<i64: 1, 8, 512>}, {pipeline_mode = #tpu.pipeline_mode<synchronous>, transform_indices = @transform_2, window_bounds = array<i64: 16, 4>}, {pipeline_mode = #tpu.pipeline_mode<synchronous>, transform_indices = @transform_3, window_bounds = array<i64: 16, 8>}, {pipeline_mode = #tpu.pipeline_mode<synchronous>, transform_indices = @transform_4, window_bounds = array<i64: 1, 16>}, {pipeline_mode = #tpu.pipeline_mode<synchronous>, transform_indices = @transform_5, window_bounds = array<i64: 4, 4>}, {pipeline_mode = #tpu.pipeline_mode<synchronous>, transform_indices = @transform_6, window_bounds = array<i64: 16, 1>}, {pipeline_mode = #tpu.pipeline_mode<synchronous>, transform_indices = @transform_7, window_bounds = array<i64: 1, 1>}, {pipeline_mode = #tpu.pipeline_mode<synchronous>, transform_indices = @transform_8, window_bounds = array<i64: 4, 1>}, {transform_indices = @transform_9, window_bounds = array<i64: 1, 4, 512>}]} {
    %c0 = arith.constant 0 : index
    %c0_0 = arith.constant 0 : index
    %c0_1 = arith.constant 0 : index
    %0 = vector.load %arg1[%c0, %c0_0, %c0_1] : memref<1x4x512xf32, #tpu.memory_space<vmem>>, vector<1x4x512xf32>
    %1 = vector.shape_cast %0 : vector<1x4x512xf32> to vector<4x512xf32>
    %c0_2 = arith.constant 0 : index
    %c0_3 = arith.constant 0 : index
    %c0_4 = arith.constant 0 : index
    %2 = vector.load %arg2[%c0_2, %c0_3, %c0_4] : memref<1x8x512xf32, #tpu.memory_space<vmem>>, vector<1x8x512xf32>
    %3 = vector.shape_cast %2 : vector<1x8x512xf32> to vector<8x512xf32>
    %c0_5 = arith.constant 0 : index
    %c0_6 = arith.constant 0 : index
    %4 = vector.load %arg3[%c0_5, %c0_6] : memref<16x4xf32, #tpu.memory_space<vmem>>, vector<16x4xf32>
    %cst = arith.constant dense<0.000000e+00> : vector<16x512xf32>
    %5 = tpu.matmul %4, %1, %cst {dimension_numbers = #tpu.dot_dimension_numbers<[1], [0], [0], [1], [0, 0, 1, 1], [], []>} : vector<16x4xf32>, vector<4x512xf32>, vector<16x512xf32> -> vector<16x512xf32>
    %c0_7 = arith.constant 0 : index
    %c0_8 = arith.constant 0 : index
    %6 = vector.load %arg4[%c0_7, %c0_8] : memref<16x8xf32, #tpu.memory_space<vmem>>, vector<16x8xf32>
    %cst_9 = arith.constant dense<0.000000e+00> : vector<16x512xf32>
    %7 = tpu.matmul %6, %3, %cst_9 {dimension_numbers = #tpu.dot_dimension_numbers<[1], [0], [0], [1], [0, 0, 1, 1], [], []>} : vector<16x8xf32>, vector<8x512xf32>, vector<16x512xf32> -> vector<16x512xf32>
    %8 = arith.addf %5, %7 : vector<16x512xf32>
    %c0_10 = arith.constant 0 : index
    %c0_11 = arith.constant 0 : index
    %9 = vector.load %arg7[%c0_10, %c0_11] : memref<16x1xf32, #tpu.memory_space<vmem>>, vector<16x1xf32>
    %10 = vector.broadcast %9 : vector<16x1xf32> to vector<16x512xf32>
    %11 = arith.addf %8, %10 : vector<16x512xf32>
    %cst_12 = arith.constant 0.000000e+00 : f32
    %12 = vector.broadcast %cst_12 : f32 to vector<16x512xf32>
    %13 = arith.maximumf %11, %12 : vector<16x512xf32>
    %c0_13 = arith.constant 0 : index
    %c0_14 = arith.constant 0 : index
    %14 = vector.load %arg5[%c0_13, %c0_14] : memref<1x16xf32, #tpu.memory_space<vmem>>, vector<1x16xf32>
    %cst_15 = arith.constant dense<0.000000e+00> : vector<1x512xf32>
    %15 = tpu.matmul %14, %13, %cst_15 {dimension_numbers = #tpu.dot_dimension_numbers<[1], [0], [0], [1], [0, 0, 1, 1], [], []>} : vector<1x16xf32>, vector<16x512xf32>, vector<1x512xf32> -> vector<1x512xf32>
    %c0_16 = arith.constant 0 : index
    %c0_17 = arith.constant 0 : index
    %16 = vector.load %arg8[%c0_16, %c0_17] : memref<1x1xf32, #tpu.memory_space<vmem>>, vector<1x1xf32>
    %17 = vector.broadcast %16 : vector<1x1xf32> to vector<1x512xf32>
    %18 = arith.addf %15, %17 : vector<1x512xf32>
    %19 = arith.negf %18 : vector<1x512xf32>
    %20 = math.exp %19 : vector<1x512xf32>
    %cst_18 = arith.constant 1.000000e+00 : f32
    %21 = vector.broadcast %cst_18 : f32 to vector<1x512xf32>
    %22 = arith.addf %21, %20 : vector<1x512xf32>
    %23 = arith.divf %21, %22 : vector<1x512xf32>
    %c0_19 = arith.constant 0 : index
    %c0_20 = arith.constant 0 : index
    %24 = vector.load %arg6[%c0_19, %c0_20] : memref<4x4xf32, #tpu.memory_space<vmem>>, vector<4x4xf32>
    %25 = vector.broadcast %23 : vector<1x512xf32> to vector<4x512xf32>
    %26 = arith.mulf %1, %25 : vector<4x512xf32>
    %cst_21 = arith.constant dense<0.000000e+00> : vector<4x512xf32>
    %27 = tpu.matmul %24, %26, %cst_21 {dimension_numbers = #tpu.dot_dimension_numbers<[1], [0], [0], [1], [0, 0, 1, 1], [], []>} : vector<4x4xf32>, vector<4x512xf32>, vector<4x512xf32> -> vector<4x512xf32>
    %c0_22 = arith.constant 0 : index
    %c0_23 = arith.constant 0 : index
    %28 = vector.load %arg9[%c0_22, %c0_23] : memref<4x1xf32, #tpu.memory_space<vmem>>, vector<4x1xf32>
    %29 = vector.broadcast %28 : vector<4x1xf32> to vector<4x512xf32>
    %30 = arith.addf %27, %29 : vector<4x512xf32>
    %cst_24 = arith.constant dense<0.000000e+00> : vector<4xf32>
    %31 = vector.multi_reduction <add>, %30, %cst_24 [1] : vector<4x512xf32> to vector<4xf32>
    %32 = vector.shape_cast %31 : vector<4xf32> to vector<4x1xf32>
    %33 = arith.mulf %30, %30 : vector<4x512xf32>
    %cst_25 = arith.constant dense<0.000000e+00> : vector<4xf32>
    %34 = vector.multi_reduction <add>, %33, %cst_25 [1] : vector<4x512xf32> to vector<4xf32>
    %35 = vector.shape_cast %34 : vector<4xf32> to vector<4x1xf32>
    %cst_26 = arith.constant 0.001953125 : f32
    %36 = vector.broadcast %cst_26 : f32 to vector<4x1xf32>
    %37 = arith.mulf %32, %36 : vector<4x1xf32>
    %cst_27 = arith.constant 0.001953125 : f32
    %38 = vector.broadcast %cst_27 : f32 to vector<4x1xf32>
    %39 = arith.mulf %35, %38 : vector<4x1xf32>
    %40 = arith.mulf %37, %37 : vector<4x1xf32>
    %41 = arith.subf %39, %40 : vector<4x1xf32>
    %cst_28 = arith.constant 0.000000e+00 : f32
    %42 = vector.broadcast %cst_28 : f32 to vector<4x1xf32>
    %43 = arith.maximumf %41, %42 : vector<4x1xf32>
    %44 = vector.broadcast %37 : vector<4x1xf32> to vector<4x512xf32>
    %45 = arith.subf %30, %44 : vector<4x512xf32>
    %cst_29 = arith.constant 9.99999974E-6 : f32
    %46 = vector.broadcast %cst_29 : f32 to vector<4x1xf32>
    %47 = arith.addf %43, %46 : vector<4x1xf32>
    %48 = math.rsqrt %47 : vector<4x1xf32>
    %49 = vector.broadcast %48 : vector<4x1xf32> to vector<4x512xf32>
    %50 = arith.mulf %45, %49 : vector<4x512xf32>
    %c0_30 = arith.constant 0 : index
    %c0_31 = arith.constant 0 : index
    %c0_32 = arith.constant 0 : index
    %51 = vector.load %arg10[%c0_30, %c0_31, %c0_32] : memref<1x4x512xf32, #tpu.memory_space<vmem>>, vector<1x4x512xf32>
    %52 = vector.shape_cast %51 : vector<1x4x512xf32> to vector<4x512xf32>
    %53 = vector.shape_cast %50 : vector<4x512xf32> to vector<1x4x512xf32>
    tpu.vector_store %arg10[%c0_30, %c0_31, %c0_32], %53 {strides = array<i32>} : memref<1x4x512xf32, #tpu.memory_space<vmem>>, vector<1x4x512xf32>,
    return
  }
  func.func @transform_0(%arg0: i32) -> (i32, i32, i32) {
    %c0_i32 = arith.constant 0 : i32
    %c0_i32_0 = arith.constant 0 : i32
    %c0_i32_1 = arith.constant 0 : i32
    return %arg0, %c0_i32, %c0_i32_0 : i32, i32, i32
  }
  func.func @transform_1(%arg0: i32) -> (i32, i32, i32) {
    %c0_i32 = arith.constant 0 : i32
    %c0_i32_0 = arith.constant 0 : i32
    %c0_i32_1 = arith.constant 0 : i32
    return %arg0, %c0_i32, %c0_i32_0 : i32, i32, i32
  }
  func.func @transform_2(%arg0: i32) -> (i32, i32) {
    %c0_i32 = arith.constant 0 : i32
    %c0_i32_0 = arith.constant 0 : i32
    %c0_i32_1 = arith.constant 0 : i32
    return %c0_i32, %c0_i32_0 : i32, i32
  }
  func.func @transform_3(%arg0: i32) -> (i32, i32) {
    %c0_i32 = arith.constant 0 : i32
    %c0_i32_0 = arith.constant 0 : i32
    %c0_i32_1 = arith.constant 0 : i32
    return %c0_i32, %c0_i32_0 : i32, i32
  }
  func.func @transform_4(%arg0: i32) -> (i32, i32) {
    %c0_i32 = arith.constant 0 : i32
    %c0_i32_0 = arith.constant 0 : i32
    %c0_i32_1 = arith.constant 0 : i32
    return %c0_i32, %c0_i32_0 : i32, i32
  }
  func.func @transform_5(%arg0: i32) -> (i32, i32) {
    %c0_i32 = arith.constant 0 : i32
    %c0_i32_0 = arith.constant 0 : i32
    %c0_i32_1 = arith.constant 0 : i32
    return %c0_i32, %c0_i32_0 : i32, i32
  }
  func.func @transform_6(%arg0: i32) -> (i32, i32) {
    %c0_i32 = arith.constant 0 : i32
    %c0_i32_0 = arith.constant 0 : i32
    %c0_i32_1 = arith.constant 0 : i32
    return %c0_i32, %c0_i32_0 : i32, i32
  }
  func.func @transform_7(%arg0: i32) -> (i32, i32) {
    %c0_i32 = arith.constant 0 : i32
    %c0_i32_0 = arith.constant 0 : i32
    %c0_i32_1 = arith.constant 0 : i32
    return %c0_i32, %c0_i32_0 : i32, i32
  }
  func.func @transform_8(%arg0: i32) -> (i32, i32) {
    %c0_i32 = arith.constant 0 : i32
    %c0_i32_0 = arith.constant 0 : i32
    %c0_i32_1 = arith.constant 0 : i32
    return %c0_i32, %c0_i32_0 : i32, i32
  }
  func.func @transform_9(%arg0: i32) -> (i32, i32, i32) {
    %c0_i32 = arith.constant 0 : i32
    %c0_i32_0 = arith.constant 0 : i32
    %c0_i32_1 = arith.constant 0 : i32
    return %arg0, %c0_i32, %c0_i32_0 : i32, i32, i32
  }
}

</mosaic_0001>

<bundles_post_ra>
// kernel: tpu_custom_call.1
= control target key start
LH: loop header
LB: loop body
LE: loop exit
PB: predicated region body
PF: predicated region fallthrough
CT: control target
= control target key end

     0   :  { %s1561_s0 = inlined_call_operand.vmem [shape: f32[2,4,512], index: 0, kind: input, shape index: {}]   ;;  %s1562_s1 = inlined_call_operand.hbm [shape: f32[2,8,512], index: 1, kind: input, shape index: {}]   ;;  %s1563_s2 = inlined_call_operand.vmem [shape: f32[16,4], index: 2, kind: input, shape index: {}]   ;;  %s1564_s3 = inlined_call_operand.vmem [shape: f32[16,8], index: 3, kind: input, shape index: {}]   ;;  %s1565_s4 = inlined_call_operand.vmem [shape: f32[1,16], index: 4, kind: input, shape index: {}]   ;;  %s1566_s5 = inlined_call_operand.vmem [shape: f32[4,4], index: 5, kind: input, shape index: {}]   ;;  %s1567_s6 = inlined_call_operand.vmem [shape: f32[16,1], index: 6, kind: input, shape index: {}]   ;;  %s1568_s7 = inlined_call_operand.<no memory space> [shape: f32[1,1], index: 7, kind: input, shape index: {}]   ;;  %s1569_s8 = inlined_call_operand.vmem [shape: f32[4,1], index: 8, kind: input, shape index: {}]   ;;  %s1570_s9 = inlined_call_operand.hbm [shape: f32[2,4,512], index: 9, kind: output, shape index: {}]  }
   0x1   :  { %v14_v0 = vstv %s1568_s7 }
   0x2   :  { %15 = vst [vmem:[#allocation2] sm:$0x1] %v14_v0 }
   0x3   :  { %16 = vsyncpa [#allocation4], 0 }
   0x4   :  { %18 = vsyncpa [#allocation4 + $0x1], 0 }
   0x5   :  { %19 = vsyncpa [#allocation5], 0 }
   0x6   :  { %21 = vsyncpa [#allocation5 + $0x1], 0  ;;  %s1349_s11 = smov 0   ;;  %s1351_s12 = smov 0  }
   0x7   :  { %s1353_s13 = smov 0   ;;  %s1355_s14 = smov 0  }
   0x8 LB: > { %1572 = sst [smem:[#allocation9_spill]] %s1289_s13  ;;  %s1370_s7 = sadd.s32 4294967295, %s1293_s14   ;;  %s1293_s14 = sphi %s1355_s14, %s1584_s14   ;;  %s1289_s13 = sphi %s1353_s13, %s1581_s13   ;;  %s1285_s12 = sphi %s1351_s12, %s1583_s12   ;;  %s1281_s11 = sphi %s1349_s11, %s1582_s11  }
   0x9   : > { %s1075_s15 = sadd.s32 4294967294, %s1293_s14   ;;  %s1374_s16 = sadd.s32 1, %s1293_s14  }
   0xa   : > { %s60_s17 = sadd.s32 1, %s1289_s13  ;;  %s57_s18 = ssub.s32 %s1293_s14, %s1374_s16 }
   0xb   : > { %p67_p0 = scmp.ne.s32.totalorder %s1289_s13, %s1285_s12  ;;  %p58_p1 = scmp.eq.s32.totalorder %s57_s18, 0 }
   0xc   : > { %p68_p2 = scmp.eq.s32.totalorder %s1293_s14, 0  ;;  %p73_p3 = scmp.ne.s32.totalorder %s1285_s12, %s1281_s11 }
   0xd   : > { %p74_p4 = scmp.eq.s32.totalorder %s1370_s7, 0  ;;  %p244_p7 = scmp.eq.s32.totalorder %s1370_s7, 1 }
   0xe   : > { %s1386_s19 = scalar_select %p58_p1, %s1289_s13, %s60_s17  }
   0xf   : > { %p1388_p5 = por %p68_p2, %p67_p0  ;;  %p1392_p6 = por %p74_p4, %p73_p3 }
  0x10   : > { %1573 = sst [smem:[#allocation10_spill]] %s1386_s19  ;;  %p250_p8 = scmp.eq.s32.totalorder %s1075_s15, 1 }
  0x11   : > { %p1142_p10 = scmp.lt.s32.totalorder %s1293_s14, 2  ;;  %p1399_p11 = por %p244_p7, %p67_p0 }
  0x12   : > { %p1403_p12 = por %p250_p8, %p73_p3  ;;  %s299_s24 = sand.u32 1, %s1289_s13  }
  0x13   : > { %s1127_s25 = sshll.u32 %s1293_s14, 5  ;;  %s1078_s26 = sshll.u32 %s299_s24, 5 }
  0x14   : > { %s308_s29 = scalar_lea.hbm %s1562_s1, %s1127_s25  ;;  %s303_s10 = scalar_lea.vmem [#allocation3], %s1078_s26 }
  0x15   : > { %s310_s30 = sshll.u32 %s308_s29, 4  ;;  %s312_s15 = sshll.u32 %s303_s10, 4  ;;  %s311_s30 = int_to_ptr.hbm [resolvable:$true] %s310_s30  ;;  %s313_s15 = int_to_ptr.vmem [resolvable:$true] %s312_s15 }
  0x16   : > { %p1414_p13 = pnand %p1142_p10, %p1388_p5  ;;  %p1081_p0 = scmp.ge.s32.totalorder %s1293_s14, 1 }
  0x17   : > { %p317_p1 = scmp.lt.s32.totalorder %s1293_s14, 3  ;;  %s300_s18 = scalar_lea.sflag [#allocation4], %s299_s24 }
  0x18   : > { %s1197_s19 = sshra.s32 %s311_s30, 4  ;;  %p1201_p3 = pneg %p1414_p13  ;;  %s1198_s19 = int_to_ptr.hbm [resolvable:$true] %s1197_s19 }
  0x19   : > { %s1199_s13 = scalar_lea.hbm %s1198_s19, 32  ;;  %s1204_s20 = scalar_lea.hbm %s1562_s1, 64 }
  0x1a   : > { %p1200_p2 = scmp.ne.s32.totalorder %s1198_s19, %s1199_s13  ;;  %p1205_p5 = scmp.lt.s32.totalorder %s1198_s19, %s1562_s1 }
  0x1b   : > { %p1206_p8 = scmp.lt.s32.totalorder %s1204_s20, %s1199_s13 }
  0x1c   : > { %p1202_p4 = pnand %p1201_p3, %p1200_p2 }
  0x1d   : > { %p1207_p10 = por %p1206_p8, %p1205_p5 }
  0x1e   : > { %p1203_p7 = pneg %p1202_p4 }
  0x20   : > { %p1208_p9 = pnand %p1207_p10, %p1203_p7 }
  0x22   : > { %1211 = shalt.err (!%p1208_p9)
}
  0x23   : > { %1137 = dma.hbm_to_vmem [thread:$0]  (!%p1414_p13), %s311_s30, 512, %s313_s15, %s300_s18  }
  0x24   : > { %p318_p2 = pnand %p1081_p0, %p317_p1 }
  0x25   : > { %s1435_s24 = sand.u32 (!%p318_p2), 1, %s1285_s12  }
  0x26   : > { %321 = sbr.rel (%p318_p2) target bundleno = 692 (0x2b4), region = 56  ;;  %s1082_s19 = sshll.u32 (!%p318_p2), %s1435_s24, 5 }
  0x27   : > { %s324_s13 = scalar_lea.sflag (!%p318_p2), [#allocation4], %s1435_s24  ;;  %s327_s29 = scalar_lea.vmem (!%p318_p2), [#allocation3], %s1082_s19 }
  0x2b   : > { %1272 = dma.done.wait (%p1392_p6), %s324_s13, 512  }
  0x2c   : > { %1274 = vsyncadd (%p1392_p6), %s324_s13, 4294966784  ;;  %p368_p9 = scmp.lt.s32.totalorder %s1370_s7, 1  ;;  %v1295_v1 = vmov 0   ;;  %v375_v2 = vld [vmem:[%s327_s29] sm:$0xff]  ;;  %v376_v3 = vld [vmem:[%s327_s29 + $0x8] sm:$0xff]  ;;  %vm383_vm0 = vcmask 64512  }
  0x2d   : > { %1177 = vset.pattern.permute.xlu0 %v1295_v1  ;;  %1178 = vset.pattern.permute.xlu1 %v1295_v1  ;;  %v377_v4 = vld [vmem:[%s327_s29 + $0x10] sm:$0xff]  ;;  %v378_v5 = vld [vmem:[%s327_s29 + $0x18] sm:$0xff]  ;;  %vm498_vm1 = vcmask 1043456   ;;  %vm491_vm2 = vcmask 31744   ;;  %vm635_vm3 = vcmask 130048   ;;  %s1083_s27 = sshll.u32 %s1435_s24, 4 }
  0x2e   : > { %s369_s30 = scalar_select %p368_p9, %s1370_s7, 1  ;;  %405 = vmatpush.msra.mxu0 %v375_v2  ;;  %428 = vmatpush.msra.mxu1 %v376_v3  ;;  %v381_v6 = vld [vmem:[%s1564_s3] sm:$0xff]  ;;  %v600_v9 = vld [vmem:[%s1567_s6 + $0x8] sm:$0xff] }
  0x2f   : > { %451 = vmatpush.msra.mxu2 %v377_v4  ;;  %474 = vmatpush.msra.mxu3 %v378_v5  ;;  %v382_v10 = vld [vmem:[%s1564_s3 + $0x8] sm:$0xff]  ;;  %v599_v15 = vld [vmem:[%s1567_s6] sm:$0xff]  ;;  %s1129_s28 = sshll.u32 %s1370_s7, 4  ;;  %s977_s7 = scalar_lea.sflag [#allocation5], %s1435_s24 }
  0x30   : > { %s1128_s10 = sshll.u32 %s369_s30, 4  ;;  %1086 = vmatmul.msk.f32.vlgmr.msra.gmra.mxu0 %vm383_vm0, %v381_v6  ;;  %1088 = vmatmul.msk.f32.vlgmr.msra.gmra.mxu1 %vm383_vm0, %v381_v6  ;;  %v379_v16 = vld [vmem:[%s1563_s2] sm:$0xff]  ;;  %v380_v17 = vld [vmem:[%s1563_s2 + $0x8] sm:$0xff]  ;;  %s988_s29 = scalar_lea.hbm %s1570_s9, %s1129_s28 }
  0x31   : > { %s372_s18 = scalar_lea.vmem %s1561_s0, %s1128_s10  ;;  %1090 = vmatmul.msk.f32.vlgmr.msra.gmra.mxu2 %vm383_vm0, %v381_v6  ;;  %1092 = vmatmul.msk.f32.vlgmr.msra.gmra.mxu3 %vm383_vm0, %v381_v6  ;;  %v628_v24 = vld [vmem:[#allocation2] sm:$0x1]  ;;  %v812_v28 = vld [vmem:[%s1569_s8] sm:$0xf]  ;;  %s367_s30 = scalar_lea.vmem [#allocation6], %s1083_s27 }
  0x32   : > { %v1451_v7 = vld [vmem:[%s372_s18 + $0x8] sm:$0xff]  ;;  %v1453_v8 = vld [vmem:[%s372_s18] sm:$0xff]  ;;  %608 = vperm.xlu0 %1177, %v600_v9   ;;  %631 = vperm.xlu1 %1178, %v628_v24   ;;  %s990_s10 = sshll.u32 %s367_s30, 4  ;;  %s992_s15 = sshll.u32 %s988_s29, 4  ;;  %s991_s10 = int_to_ptr.vmem [resolvable:$true] %s990_s10  ;;  %s993_s15 = int_to_ptr.hbm [resolvable:$true] %s992_s15 }
  0x33   : > { %486 = vst [vmem:[#allocation1 + $0x10] ss:$2 sm:$0xff] %v1451_v7  ;;  %v627_v52 = vld [vmem:[%s1565_s4] sm:$0x1]  ;;  %s1241_s17 = sshra.s32 %s993_s15, 4  ;;  %s1247_s26 = scalar_lea.hbm %s1570_s9, 32  ;;  %s1242_s17 = int_to_ptr.hbm [resolvable:$true] %s1241_s17 }
  0x34   : > { %484 = vst [vmem:[#allocation1] ss:$2 sm:$0xff] %v1453_v8  ;;  %s1243_s18 = scalar_lea.hbm %s1242_s17, 16  ;;  %p1248_p1 = scmp.lt.s32.totalorder %s1242_s17, %s1570_s9 }
  0x35   : > { %p1244_p6 = scmp.ne.s32.totalorder %s1242_s17, %s1243_s18  ;;  %p1249_p3 = scmp.lt.s32.totalorder %s1247_s26, %s1243_s18 }
  0x37   : > { %p1245_p13 = pnand %p1244_p6, %p1399_p11  ;;  %p1250_p4 = por %p1249_p3, %p1248_p1 }
  0x38   : > { %1087 = vmatmul.msk.f32.gmra.mxu0 %vm383_vm0, %v382_v10  ;;  %1089 = vmatmul.msk.f32.gmra.mxu1 %vm383_vm0, %v382_v10 }
  0x39   : > { %1091 = vmatmul.msk.f32.gmra.mxu2 %vm383_vm0, %v382_v10  ;;  %1093 = vmatmul.msk.f32.gmra.mxu3 %vm383_vm0, %v382_v10  ;;  %p1246_p0 = pneg %p1245_p13 }
  0x3a   : > { %v490_v11 = vld.sshfl [vmem:[#allocation1 + $0x18] sm:$0xff pattern:$0x75316420]  ;;  %v489_v12 = vld.sshfl [vmem:[#allocation1 + $0x10] sm:$0xff pattern:$0x75316420]  ;;  %603 = vperm.xlu0 %1177, %v599_v15   ;;  %815 = vperm.xlu1 %1178, %v812_v28  }
  0x3b   : > { %v487_v13 = vld.sshfl [vmem:[#allocation1] sm:$0xff pattern:$0x75316420]  ;;  %v488_v14 = vld.sshfl [vmem:[#allocation1 + $0x8] sm:$0xff pattern:$0x75316420]  ;;  %1103 = vmatpush.msk.msrb.mxu3 %vm498_vm1, %v490_v11  ;;  %1100 = vmatpush.msk.msrb.mxu2 %vm498_vm1, %v489_v12  ;;  %p1251_p7 = pnand %p1250_p4, %p1246_p0 }
  0x3c   : > { %1094 = vmatpush.msk.msrb.mxu0 %vm498_vm1, %v487_v13  ;;  %1097 = vmatpush.msk.msrb.mxu1 %vm498_vm1, %v488_v14 }
  0x40   : > { %1095 = vmatmul.msk.f32.vlgmr.msrb.gmra.mxu0 %vm491_vm2, %v379_v16  ;;  %1098 = vmatmul.msk.f32.vlgmr.msrb.gmra.mxu1 %vm491_vm2, %v379_v16 }
  0x41   : > { %1101 = vmatmul.msk.f32.vlgmr.msrb.gmra.mxu2 %vm491_vm2, %v379_v16  ;;  %1104 = vmatmul.msk.f32.vlgmr.msrb.gmra.mxu3 %vm491_vm2, %v379_v16 }
  0x48   : > { %1096 = vmatmul.msk.f32.gmra.mxu0 %vm491_vm2, %v380_v17  ;;  %1099 = vmatmul.msk.f32.gmra.mxu1 %vm491_vm2, %v380_v17 }
  0x49   : > { %1102 = vmatmul.msk.f32.gmra.mxu2 %vm491_vm2, %v380_v17  ;;  %1105 = vmatmul.msk.f32.gmra.mxu3 %vm491_vm2, %v380_v17 }
  0xa4   : > { %v609_v25 = vpop.permute.xlu0 %608  ;;  %v632_v63 = vpop.permute.xlu1 %631 }
  0xa5   : > { %v634_v0 = vperm.slane %v632_v63, 0 }
  0xac   : > { %v604_v31 = vpop.permute.xlu0 %603 }
  0xad   : > { %v407_v18 = vpop.f32.mrf.mxu0  ;;  %v430_v19 = vpop.f32.mrf.mxu1 }
  0xb4   : > { %v453_v20 = vpop.f32.mrf.mxu2  ;;  %v476_v21 = vpop.f32.mrf.mxu3 }
  0xb5   : > { %v410_v22 = vpop.f32.mrf.mxu0  ;;  %v433_v23 = vpop.f32.mrf.mxu1 }
  0xbc   : > { %v456_v26 = vpop.f32.mrf.mxu2  ;;  %v479_v27 = vpop.f32.mrf.mxu3 }
  0xbd   : > { %v524_v29 = vpop.f32.mrf.mxu0  ;;  %v547_v30 = vpop.f32.mrf.mxu1 }
  0xbe   : > { %v525_v32 = vadd.f32 %v524_v29, %v407_v18  ;;  %v548_v33 = vadd.f32 %v547_v30, %v430_v19 }
  0xc0   : > { %v611_v40 = vadd.f32 %v604_v31, %v525_v32  ;;  %v612_v41 = vadd.f32 %v604_v31, %v548_v33 }
  0xc2   : > { %v619_v50 = vmax.f32 %v611_v40, 0.0  ;;  %v620_v51 = vmax.f32 %v612_v41, 0.0 }
  0xc4   : > { %v570_v34 = vpop.f32.mrf.mxu2  ;;  %v593_v35 = vpop.f32.mrf.mxu3 }
  0xc5   : > { %v527_v36 = vpop.f32.mrf.mxu0  ;;  %v550_v37 = vpop.f32.mrf.mxu1  ;;  %v571_v44 = vadd.f32 %v570_v34, %v453_v20  ;;  %v594_v47 = vadd.f32 %v593_v35, %v476_v21 }
  0xc6   : > { %v528_v38 = vadd.f32 %v527_v36, %v410_v22  ;;  %v551_v39 = vadd.f32 %v550_v37, %v433_v23 }
  0xc7   : > { %v613_v55 = vadd.f32 %v604_v31, %v571_v44  ;;  %v614_v56 = vadd.f32 %v604_v31, %v594_v47 }
  0xc8   : > { %v615_v42 = vadd.f32 %v609_v25, %v528_v38  ;;  %v616_v43 = vadd.f32 %v609_v25, %v551_v39 }
  0xc9   : > { %v621_v61 = vmax.f32 %v613_v55, 0.0  ;;  %v622_v62 = vmax.f32 %v614_v56, 0.0 }
  0xca   : > { %v623_v45 = vmax.f32 %v615_v42, 0.0  ;;  %v624_v46 = vmax.f32 %v616_v43, 0.0 }
  0xcc   : > { %v573_v48 = vpop.f32.mrf.mxu2  ;;  %v596_v49 = vpop.f32.mrf.mxu3  ;;  %653 = vmatpush.msra.mxu0 %v623_v45  ;;  %673 = vmatpush.msra.mxu1 %v624_v46 }
  0xcd   : > { %v574_v53 = vadd.f32 %v573_v48, %v456_v26  ;;  %v597_v54 = vadd.f32 %v596_v49, %v479_v27 }
  0xce   : > { %654 = vmatpush.msra.mxu0 %v619_v50  ;;  %674 = vmatpush.msra.mxu1 %v620_v51 }
  0xcf   : > { %v617_v57 = vadd.f32 %v609_v25, %v574_v53  ;;  %v618_v58 = vadd.f32 %v609_v25, %v597_v54  ;;  %1107 = vmatmul.msk.f32.vlgmr.msra.gmra.mxu1 %vm635_vm3, %v627_v52  ;;  %1106 = vmatmul.msk.f32.vlgmr.msra.gmra.mxu0 %vm635_vm3, %v627_v52 }
  0xd1   : > { %v625_v59 = vmax.f32 %v617_v57, 0.0  ;;  %v626_v60 = vmax.f32 %v618_v58, 0.0 }
  0xd3   : > { %693 = vmatpush.msra.mxu2 %v625_v59  ;;  %713 = vmatpush.msra.mxu3 %v626_v60 }
  0xd5   : > { %694 = vmatpush.msra.mxu2 %v621_v61  ;;  %714 = vmatpush.msra.mxu3 %v622_v62 }
  0xd6   : > { %1108 = vmatmul.msk.f32.vlgmr.msra.gmra.mxu2 %vm635_vm3, %v627_v52  ;;  %1109 = vmatmul.msk.f32.vlgmr.msra.gmra.mxu3 %vm635_vm3, %v627_v52 }
 0x14c   : > { %v676_v1 = vpop.f32.mrf.mxu1  ;;  %v656_v2 = vpop.f32.mrf.mxu0 }
 0x14d   : > { %v677_v3 = vadd.f32 %v676_v1, %v634_v0  ;;  %v657_v4 = vadd.f32 %v656_v2, %v634_v0 }
 0x14f   : > { %v1111_v5 = vmul.f32 -1.442695, %v677_v3  ;;  %v1110_v6 = vmul.f32 -1.442695, %v657_v4 }
 0x151   : > { %1179 = vpow2.f32 %v1111_v5 }
 0x152   : > { %1181 = vpow2.f32 %v1110_v6 }
 0x157   : > { %v1180_v9 = vpop.eup %1179 }
 0x158   : > { %v1182_v10 = vpop.eup %1181  ;;  %v732_v11 = vadd.f32 1.0, %v1180_v9 }
 0x159   : > { %v731_v12 = vadd.f32 1.0, %v1182_v10  ;;  %v696_v13 = vpop.f32.mrf.mxu2  ;;  %v716_v14 = vpop.f32.mrf.mxu3 }
 0x15a   : > { %1183 = vrcp.f32 %v732_v11  ;;  %v697_v15 = vadd.f32 %v696_v13, %v634_v0  ;;  %v717_v16 = vadd.f32 %v716_v14, %v634_v0  ;;  %vm755_vm4 = vweird.f32 %v732_v11  ;;  %v795_v0 = vld [vmem:[%s1566_s5] sm:$0xf] }
 0x15b   : > { %1185 = vrcp.f32 %v731_v12  ;;  %v761_v22 = vand.u32 2147483648, %v732_v11  ;;  %v759_v25 = vand.u32 2147483647, %v732_v11  ;;  %v746_v26 = vand.u32 2147483648, %v731_v12 }
 0x15c   : > { %v1112_v17 = vmul.f32 -1.442695, %v697_v15  ;;  %v1113_v18 = vmul.f32 -1.442695, %v717_v16  ;;  %vm740_vm6 = vweird.f32 %v731_v12  ;;  %v744_v28 = vand.u32 2147483647, %v731_v12 }
 0x15d   : > { %v762_v31 = vor.u32 1.1754944e-38, %v761_v22  ;;  %vm760_vm9 = vcmp.eq.f32.partialorder %v759_v25, 8.507059e+37  ;;  %v747_v35 = vor.u32 1.1754944e-38, %v746_v26 }
 0x15e   : > { %1187 = vpow2.f32 %v1112_v17  ;;  %vm745_vm11 = vcmp.eq.f32.partialorder %v744_v28, 8.507059e+37  ;;  %v816_v17 = vpop.permute.xlu1 %815 }
 0x15f   : > { %1189 = vpow2.f32 %v1113_v18 }
 0x160   : > { %v1184_v19 = vpop.eup %1183 }
 0x161   : > { %v1186_v20 = vpop.eup %1185  ;;  %v751_v21 = vmul.f32 %v1184_v19, %v732_v11  ;;  %vm756_vm5 = vweird.f32 %v1184_v19 }
 0x162   : > { %v736_v23 = vmul.f32 %v1186_v20, %v731_v12  ;;  %vm741_vm7 = vweird.f32 %v1186_v20  ;;  %vm757_vm8 = vmor %vm755_vm4, %vm756_vm5 }
 0x163   : > { %v752_v24 = vsub.f32 1.0, %v751_v21  ;;  %vm742_vm10 = vmor %vm740_vm6, %vm741_vm7 }
 0x164   : > { %v737_v27 = vsub.f32 1.0, %v736_v23  ;;  %v1188_v30 = vpop.eup %1187 }
 0x165   : > { %v753_v29 = vmul.f32 %v1184_v19, %v752_v24  ;;  %v1190_v33 = vpop.eup %1189  ;;  %v733_v36 = vadd.f32 1.0, %v1188_v30 }
 0x166   : > { %v738_v32 = vmul.f32 %v1186_v20, %v737_v27  ;;  %v734_v38 = vadd.f32 1.0, %v1190_v33 }
 0x167   : > { %v754_v34 = vadd.f32 %v1184_v19, %v753_v29  ;;  %1191 = vrcp.f32 %v733_v36  ;;  %v774_v53 = vand.u32 2147483647, %v733_v36  ;;  %v776_v54 = vand.u32 2147483648, %v733_v36 }
 0x168   : > { %v739_v37 = vadd.f32 %v1186_v20, %v738_v32  ;;  %1193 = vrcp.f32 %v734_v38  ;;  %v789_v57 = vand.u32 2147483647, %v734_v38  ;;  %v791_v58 = vand.u32 2147483648, %v734_v38 }
 0x169   : > { %v758_v39 = vsel %vm757_vm8, %v1184_v19, %v754_v34  ;;  %vm770_vm14 = vweird.f32 %v733_v36  ;;  %vm775_vm0 = vcmp.eq.f32.partialorder %v774_v53, 8.507059e+37  ;;  %vm785_vm3 = vweird.f32 %v734_v38 }
 0x16a   : > { %v763_v40 = vsel %vm760_vm9, %v762_v31, %v758_v39  ;;  %v743_v41 = vsel %vm742_vm10, %v1186_v20, %v739_v37  ;;  %v777_v62 = vor.u32 1.1754944e-38, %v776_v54  ;;  %vm790_vm5 = vcmp.eq.f32.partialorder %v789_v57, 8.507059e+37 }
 0x16b   : > { %v797_v42 = vperm.slane %v763_v40, 0  ;;  %v748_v43 = vsel %vm745_vm11, %v747_v35, %v743_v41  ;;  %v792_v63 = vor.u32 1.1754944e-38, %v791_v58 }
 0x16c   : > { %v796_v45 = vperm.slane %v748_v43, 0 }
 0x16d   : > { %v804_v44 = vrot.slane %v797_v42, 4  ;;  %v1192_v46 = vpop.eup %1191 }
 0x16e   : > { %v1194_v48 = vpop.eup %1193  ;;  %v766_v50 = vmul.f32 %v1192_v46, %v733_v36  ;;  %vm771_vm12 = vweird.f32 %v1192_v46 }
 0x16f   : > { %v806_v47 = vsel %vm498_vm1, %v796_v45, %v804_v44  ;;  %v781_v51 = vmul.f32 %v1194_v48, %v734_v38  ;;  %vm786_vm13 = vweird.f32 %v1194_v48  ;;  %vm772_vm15 = vmor %vm770_vm14, %vm771_vm12 }
 0x170   : > { %v810_v49 = vmul.f32 %v806_v47, %v1453_v8  ;;  %v767_v52 = vsub.f32 1.0, %v766_v50  ;;  %vm787_vm4 = vmor %vm785_vm3, %vm786_vm13 }
 0x171   : > { %v782_v55 = vsub.f32 1.0, %v781_v51 }
 0x172   : > { %820 = vst [vmem:[#allocation1] ss:$2 sm:$0xff] %v810_v49  ;;  %v768_v56 = vmul.f32 %v1192_v46, %v767_v52 }
 0x173   : > { %v783_v59 = vmul.f32 %v1194_v48, %v782_v55 }
 0x174   : > { %v769_v60 = vadd.f32 %v1192_v46, %v768_v56 }
 0x175   : > { %v784_v61 = vadd.f32 %v1194_v48, %v783_v59 }
 0x176   : > { %v773_v8 = vsel %vm772_vm15, %v1192_v46, %v769_v60 }
 0x177   : > { %v788_v1 = vsel %vm787_vm4, %v1194_v48, %v784_v61  ;;  %v778_v4 = vsel %vm775_vm0, %v777_v62, %v773_v8 }
 0x178   : > { %v793_v5 = vsel %vm790_vm5, %v792_v63, %v788_v1  ;;  %v798_v9 = vperm.slane %v778_v4, 0 }
 0x179   : > { %v823_v2 = vld.sshfl [vmem:[#allocation1] sm:$0xff pattern:$0x75316420]  ;;  %v824_v3 = vld.sshfl [vmem:[#allocation1 + $0x8] sm:$0xff pattern:$0x75316420] }
 0x17a   : > { %1114 = vmatpush.msk.msrb.mxu0 %vm498_vm1, %v823_v2  ;;  %1116 = vmatpush.msk.msrb.mxu1 %vm498_vm1, %v824_v3  ;;  %v799_v6 = vperm.slane %v793_v5, 0 }
 0x17b   : > { %1115 = vmatmul.msk.f32.vlgmr.msrb.gmra.mxu0 %vm491_vm2, %v795_v0  ;;  %1117 = vmatmul.msk.f32.vlgmr.msrb.gmra.mxu1 %vm491_vm2, %v795_v0 }
 0x17c   : > { %v805_v10 = vrot.slane %v799_v6, 4 }
 0x17e   : > { %v807_v11 = vsel %vm498_vm1, %v798_v9, %v805_v10 }
 0x17f   : > { %v811_v12 = vmul.f32 %v807_v11, %v1451_v7 }
 0x181   : > { %822 = vst [vmem:[#allocation1 + $0x10] ss:$2 sm:$0xff] %v811_v12 }
 0x188   : > { %v825_v13 = vld.sshfl [vmem:[#allocation1 + $0x10] sm:$0xff pattern:$0x75316420]  ;;  %v826_v14 = vld.sshfl [vmem:[#allocation1 + $0x18] sm:$0xff pattern:$0x75316420] }
 0x189   : > { %1118 = vmatpush.msk.msrb.mxu2 %vm498_vm1, %v825_v13  ;;  %1120 = vmatpush.msk.msrb.mxu3 %vm498_vm1, %v826_v14 }
 0x18a   : > { %1119 = vmatmul.msk.f32.vlgmr.msrb.gmra.mxu2 %vm491_vm2, %v795_v0  ;;  %1121 = vmatmul.msk.f32.vlgmr.msrb.gmra.mxu3 %vm491_vm2, %v795_v0 }
 0x1f8   : > { %v855_v15 = vpop.f32.mrf.mxu0  ;;  %v875_v16 = vpop.f32.mrf.mxu1 }
 0x1f9   : > { %v856_v18 = vadd.f32 %v855_v15, %v816_v17  ;;  %v876_v19 = vadd.f32 %v875_v16, %v816_v17 }
 0x1fb   : > { %v918_v20 = vsel %vm498_vm1, %v856_v18, 0.0  ;;  %v919_v7 = vsel %vm498_vm1, %v876_v19, 0.0  ;;  %v927_v23 = vmul.f32 %v856_v18, %v856_v18  ;;  %v928_v24 = vmul.f32 %v876_v19, %v876_v19 }
 0x1fc   : > { %v920_v27 = vadd.f32 %v919_v7, %v918_v20 }
 0x1fd   : > { %v931_v32 = vsel %vm498_vm1, %v927_v23, 0.0  ;;  %v932_v33 = vsel %vm498_vm1, %v928_v24, 0.0 }
 0x1fe   : > { %v933_v36 = vadd.f32 %v932_v33, %v931_v32 }
 0x20d   : > { %v895_v21 = vpop.f32.mrf.mxu2  ;;  %v915_v22 = vpop.f32.mrf.mxu3 }
 0x20e   : > { %v896_v25 = vadd.f32 %v895_v21, %v816_v17  ;;  %v916_v26 = vadd.f32 %v915_v22, %v816_v17 }
 0x210   : > { %v929_v28 = vmul.f32 %v896_v25, %v896_v25  ;;  %v921_v29 = vsel %vm498_vm1, %v896_v25, 0.0  ;;  %v923_v31 = vsel %vm498_vm1, %v916_v26, 0.0  ;;  %v930_v37 = vmul.f32 %v916_v26, %v916_v26 }
 0x211   : > { %v922_v30 = vadd.f32 %v921_v29, %v920_v27 }
 0x212   : > { %v934_v35 = vsel %vm498_vm1, %v929_v28, 0.0  ;;  %v936_v39 = vsel %vm498_vm1, %v930_v37, 0.0 }
 0x213   : > { %v924_v34 = vadd.f32 %v923_v31, %v922_v30  ;;  %v935_v38 = vadd.f32 %v934_v35, %v933_v36 }
 0x215   : > { %925 = vadd.xlane.f32.xlu2 %v924_v34  ;;  %v937_v40 = vadd.f32 %v936_v39, %v935_v38 }
 0x21d   : > { %938 = vadd.xlane.f32.xlu2 %v937_v40 }
 0x288   : > { %v926_v41 = vpop.xlane.xlu2 %925 }
 0x289   : > { %v940_v42 = vmul.f32 0.001953125, %v926_v41 }
 0x28b   : > { %v942_v44 = vmul.f32 %v940_v42, %v940_v42  ;;  %v946_v55 = vsub.f32 %v876_v19, %v940_v42  ;;  %v948_v56 = vsub.f32 %v916_v26, %v940_v42  ;;  %v945_v58 = vsub.f32 %v856_v18, %v940_v42 }
 0x28c   : > { %v947_v59 = vsub.f32 %v896_v25, %v940_v42 }
 0x290   : > { %v939_v43 = vpop.xlane.xlu2 %938 }
 0x291   : > { %v941_v45 = vmul.f32 0.001953125, %v939_v43 }
 0x293   : > { %v943_v46 = vsub.f32 %v941_v45, %v942_v44 }
 0x295   : > { %v944_v47 = vmax.f32 %v943_v46, 0.0 }
 0x297   : > { %v949_v48 = vadd.f32 1e-05, %v944_v47 }
 0x299   : > { %1195 = vrsqrt.f32 %v949_v48  ;;  %vm956_vm6 = vweird.f32 %v949_v48 }
 0x29f   : > { %v1196_v49 = vpop.eup %1195 }
 0x2a0   : > { %v951_v50 = vmul.f32 %v1196_v49, %v949_v48  ;;  %vm957_vm2 = vweird.f32 %v1196_v49 }
 0x2a1   : > { %vm958_vm7 = vmor %vm956_vm6, %vm957_vm2 }
 0x2a2   : > { %v952_v51 = vmul.f32 %v1196_v49, %v951_v50 }
 0x2a4   : > { %v953_v52 = vmul.f32 0.5, %v952_v51 }
 0x2a6   : > { %v954_v53 = vsub.f32 1.5, %v953_v52 }
 0x2a8   : > { %v955_v54 = vmul.f32 %v1196_v49, %v954_v53 }
 0x2aa   : > { %v959_v57 = vsel %vm958_vm7, %v1196_v49, %v955_v54 }
 0x2ab   : > { %v961_v60 = vmul.f32 %v959_v57, %v946_v55  ;;  %v963_v61 = vmul.f32 %v959_v57, %v948_v56  ;;  %v960_v8 = vmul.f32 %v959_v57, %v945_v58  ;;  %v962_v62 = vmul.f32 %v959_v57, %v947_v59 }
 0x2ad   : > { %v968_v63 = vrot.slane %v961_v60, 4  ;;  %v969_v0 = vrot.slane %v963_v61, 4 }
 0x2af   : > { %v970_v1 = vsel %vm498_vm1, %v960_v8, %v968_v63  ;;  %v971_v2 = vsel %vm498_vm1, %v962_v62, %v969_v0 }
 0x2b0   : > { %974 = vst [vmem:[%s367_s30] sm:$0xff] %v970_v1 }
 0x2b1   : > { %975 = vst [vmem:[%s367_s30 + $0x8] sm:$0xff] %v971_v2 }
 0x2b2   : > { %1254 = shalt.err (!%p1251_p7)
}
 0x2b3   : > { %1132 = dma.vmem_to_hbm [thread:$0]  (%p1399_p11), %s991_s10, 256, %s993_s15, %s977_s7  }
 0x2b4 PF: > { %s1004_s24 = sand.u32 1, %s1281_s11   ;;  %p1579_p5 = scmp.ge.s32.totalorder %s1293_s14, 2 }
 0x2b5   : > { %s1005_s28 = scalar_lea.sflag [#allocation5], %s1004_s24 }
 0x2b6   : > { %p1139_p8 = pnand %p1579_p5, %p1403_p12 }
 0x2b8   : > { %p1140_p10 = pneg %p1139_p8 }
 0x2ba   : > { %1276 = dma.done.wait (%p1140_p10), %s1005_s28, 256  }
 0x2bb   : > { %1278 = vsyncadd (%p1140_p10), %s1005_s28, 4294967040  ;;  %s1580_s19 = sld [smem:[#allocation9_spill]]  ;;  %p24_p2 = scmp.ge.s32.totalorder %s1374_s16, 4  }
 0x2bc   : > { %s1581_s13 = sld [smem:[#allocation10_spill]]  ;;  %s1582_s11 = smov %s1285_s12 }
 0x2bd   : > { %s1584_s14 = smov %s1374_s16  ;;  %26 = sbr.rel (!%p24_p2) target bundleno = 8 (0x8), region = 106 }
 0x2c1   : > { %s1583_s12 = smov %s1580_s19 }
 0x2c2   :  { %1011 = vsyncpa [#allocation4], 1 }
 0x2c3   :  { %1013 = vsyncpa [#allocation4 + $0x1], 1 }
 0x2c4   :  { %1014 = vsyncpa [#allocation5], 1 }
 0x2c5   :  { %1016 = vsyncpa [#allocation5 + $0x1], 1 }

</bundles_post_ra>
